<compile_context>
chip_gen: v7x
topology: tpu7x:2x2x1
jax: 0.10.0
libtpu: 0.0.40
codegen_flags: <defaults>
</compile_context>

<pallas_src>
import functools

import jax
import jax.numpy as jnp
from jax.experimental import pallas as pl
from jax.experimental.pallas import tpu as pltpu

IGNORE_INDEX = -100
_DEFAULT_TILE_N = 512  # rows per grid step; safe for v5e/v6e/v7x scoped VMEM


def _ce_partial(logits, tgt_col, row_valid):
    """Per-tile cross-entropy partial sums.

    logits: (T, C) f32, tgt_col: (T, 1) i32, row_valid: (T, 1) bool.
    Returns (sum of per-row CE over valid rows, number of valid rows).
    """
    t, c = logits.shape
    m = jnp.max(logits, axis=-1, keepdims=True)                       # (T, 1)
    lse = m + jnp.log(jnp.sum(jnp.exp(logits - m), axis=-1, keepdims=True))
    cls_idx = jax.lax.broadcasted_iota(jnp.int32, (t, c), 1)          # (T, C)
    # select-gather of the target logit (no bool->f32 cast, no multiply)
    tgt_logit = jnp.sum(jnp.where(cls_idx == tgt_col, logits, 0.0),
                        axis=-1, keepdims=True)                       # (T, 1)
    valid = jnp.logical_and(tgt_col != IGNORE_INDEX, row_valid)       # (T, 1)
    per_row = jnp.where(valid, lse - tgt_logit, 0.0)
    return jnp.sum(per_row), jnp.sum(valid.astype(jnp.float32))


def _make_loss_kernel(*, has_mask, n_rows, tile_n, pos_dim, n_staff_classes,
                      symbol_weight, position_weight, staff_position_weight):
    inv_pos_denom = 1.0 / float(n_rows * pos_dim)

    def kernel(*refs):
        if has_mask:
            (sym_ref, staff_ref, pos_pred_ref, pos_tgt_ref, tgt_ref,
             mask_ref, out_ref, acc_ref) = refs
        else:
            (sym_ref, staff_ref, pos_pred_ref, pos_tgt_ref, tgt_ref,
             out_ref, acc_ref) = refs
            mask_ref = None

        step = pl.program_id(0)
        n_steps = pl.num_programs(0)

        @pl.when(step == 0)
        def _init():
            for i in range(5):
                acc_ref[i] = jnp.float32(0.0)

        # Load and upcast to f32 inside the kernel (inputs may be bf16).
        sym_logits = sym_ref[...].astype(jnp.float32)       # (T, C_sym)
        staff_logits = staff_ref[...].astype(jnp.float32)   # (T, C_staff)
        pos_pred = pos_pred_ref[...].astype(jnp.float32)    # (T, P)
        pos_tgt = pos_tgt_ref[...].astype(jnp.float32)      # (T, P)
        tgt = tgt_ref[...]                                   # (T, 2) i32
        sym_tgt = tgt[:, 0:1]                                # (T, 1)
        staff_tgt = tgt[:, 1:2]                              # (T, 1)

        if has_mask:
            m = mask_ref[...].astype(jnp.float32)            # (T, 1)
            sym_logits = sym_logits * m
            staff_logits = staff_logits * m
            pos_pred = pos_pred * m

        # Rows past n_rows (remainder-tile padding) must not contribute.
        row_ids = step * tile_n + jax.lax.broadcasted_iota(
            jnp.int32, (tile_n, 1), 0)
        row_valid = row_ids < n_rows                         # (T, 1) bool

        # Symbol classification (ignore_index = -100).
        sym_sum, sym_cnt = _ce_partial(sym_logits, sym_tgt, row_valid)

        # Staff position classification: clamp targets first (as in PyTorch).
        staff_tgt_clamped = jnp.clip(staff_tgt, 0, n_staff_classes - 1)
        staff_sum, staff_cnt = _ce_partial(staff_logits, staff_tgt_clamped,
                                           row_valid)

        # SmoothL1 (beta=1) numerator.
        diff = pos_pred - pos_tgt
        ad = jnp.abs(diff)
        per = jnp.where(ad < 1.0, 0.5 * diff * diff, ad - 0.5)
        per = jnp.where(row_valid, per, 0.0)
        l1_sum = jnp.sum(per)

        acc_ref[0] += sym_sum
        acc_ref[1] += sym_cnt
        acc_ref[2] += staff_sum
        acc_ref[3] += staff_cnt
        acc_ref[4] += l1_sum

        @pl.when(step == n_steps - 1)
        def _finalize():
            symbol_loss = acc_ref[0] / acc_ref[1]
            staff_loss = acc_ref[2] / acc_ref[3]
            position_loss = acc_ref[4] * inv_pos_denom
            total = (symbol_weight * symbol_loss
                     + position_weight * position_loss
                     + staff_position_weight * staff_loss)
            out_ref[0] = symbol_loss
            out_ref[1] = position_loss
            out_ref[2] = staff_loss
            out_ref[3] = total

    return kernel


def music_notation_loss(predictions, targets, mask=None,
                        symbol_weight=1.0, position_weight=1.0,
                        staff_position_weight=1.0,
                        tile_n=_DEFAULT_TILE_N):
    symbol_logits = predictions['symbol_logits']
    position_preds = predictions['position_preds']
    staff_position_logits = predictions['staff_position_logits']
    symbol_targets = targets['symbol_ids']
    position_targets = targets['positions']
    staff_position_targets = targets['staff_positions']

    # Shape normalisation (mirrors the squeeze(0) logic in the module;
    # torch.squeeze(0) is a no-op unless dim 0 is size 1).
    if (symbol_logits.ndim == 3 and symbol_targets.ndim == 1
            and symbol_logits.shape[0] == 1):
        symbol_logits = jnp.squeeze(symbol_logits, 0)
    if (position_preds.ndim == 3 and position_targets.ndim == 2
            and position_preds.shape[0] == 1):
        position_preds = jnp.squeeze(position_preds, 0)
    if (staff_position_logits.ndim == 3 and staff_position_targets.ndim == 1
            and staff_position_logits.shape[0] == 1):
        staff_position_logits = jnp.squeeze(staff_position_logits, 0)

    c_sym = symbol_logits.shape[-1]
    c_staff = staff_position_logits.shape[-1]
    p_dim = position_preds.shape[-1]

    # Flatten to (N, C) rows; keep the native dtype (bf16 stays bf16 — the
    # upcast to f32 happens inside the kernel).
    sym_logits2 = symbol_logits.reshape(-1, c_sym)
    staff_logits2 = staff_position_logits.reshape(-1, c_staff)
    pos_pred2 = position_preds.reshape(-1, p_dim)
    pos_tgt2 = position_targets.reshape(-1, p_dim)
    n_rows = sym_logits2.shape[0]

    # Pack the two integer target columns into one (N, 2) i32 stream.
    tgt2 = jnp.stack(
        [symbol_targets.reshape(-1).astype(jnp.int32),
         staff_position_targets.reshape(-1).astype(jnp.int32)], axis=-1)

    has_mask = mask is not None

    # Row tiling: one block if small, else a multiple-of-8 tile.
    if n_rows <= tile_n:
        tile_rows = n_rows
    else:
        tile_rows = max(8, (tile_n // 8) * 8)
    num_tiles = pl.cdiv(n_rows, tile_rows)

    kernel = _make_loss_kernel(
        has_mask=has_mask, n_rows=n_rows, tile_n=tile_rows, pos_dim=p_dim,
        n_staff_classes=c_staff,
        symbol_weight=float(symbol_weight),
        position_weight=float(position_weight),
        staff_position_weight=float(staff_position_weight))

    in_specs = [
        pl.BlockSpec((tile_rows, c_sym), lambda i: (i, 0)),
        pl.BlockSpec((tile_rows, c_staff), lambda i: (i, 0)),
        pl.BlockSpec((tile_rows, p_dim), lambda i: (i, 0)),
        pl.BlockSpec((tile_rows, p_dim), lambda i: (i, 0)),
        pl.BlockSpec((tile_rows, 2), lambda i: (i, 0)),
    ]
    inputs = [sym_logits2, staff_logits2, pos_pred2, pos_tgt2, tgt2]
    if has_mask:
        mask2 = mask.reshape(-1, 1)
        in_specs.append(pl.BlockSpec((tile_rows, 1), lambda i: (i, 0)))
        inputs.append(mask2)

    losses = pl.pallas_call(
        kernel,
        out_shape=jax.ShapeDtypeStruct((4,), jnp.float32),
        grid_spec=pltpu.PrefetchScalarGridSpec(
            num_scalar_prefetch=0,
            grid=(num_tiles,),
            in_specs=in_specs,
            out_specs=pl.BlockSpec(memory_space=pltpu.SMEM),
            scratch_shapes=[pltpu.SMEM((8,), jnp.float32)]),
        compiler_params=pltpu.CompilerParams(
            dimension_semantics=("arbitrary",)),
    )(*inputs)

    total_loss = losses[3]
    # JAX scalars (no float() host syncs — jit/grad friendly).
    loss_dict = {
        'symbol_loss': losses[0],
        'position_loss': losses[1],
        'staff_position_loss': losses[2],
        'total_loss': losses[3],
    }
    return total_loss, loss_dict


# ----------------------- pure-JAX reference (for checking) -----------------
def _ref_ce(logits, tgt):
    lse = jax.nn.logsumexp(logits, axis=-1)
    safe_tgt = jnp.where(tgt == IGNORE_INDEX, 0, tgt)
    tgt_logit = jnp.take_along_axis(logits, safe_tgt[:, None], axis=-1)[:, 0]
    valid = (tgt != IGNORE_INDEX)
    per = jnp.where(valid, lse - tgt_logit, 0.0)
    return jnp.sum(per) / jnp.sum(valid.astype(jnp.float32))


def _ref_loss(preds, tgts, mask=None, symbol_weight=1.0, position_weight=1.0,
              staff_position_weight=1.0):
    sym = preds['symbol_logits'].astype(jnp.float32)
    pos = preds['position_preds'].astype(jnp.float32)
    staff = preds['staff_position_logits'].astype(jnp.float32)
    if mask is not None:
        m = mask[..., None].astype(jnp.float32)
        sym = sym * m
        pos = pos * m
        staff = staff * m
    sl = sym.reshape(-1, sym.shape[-1])
    st = tgts['symbol_ids'].reshape(-1)
    symbol_loss = _ref_ce(sl, st)
    diff = pos - tgts['positions'].astype(jnp.float32)
    ad = jnp.abs(diff)
    position_loss = jnp.mean(jnp.where(ad < 1.0, 0.5 * diff * diff, ad - 0.5))
    spl = staff.reshape(-1, staff.shape[-1])
    spt = jnp.clip(tgts['staff_positions'].reshape(-1), 0, spl.shape[-1] - 1)
    staff_loss = _ref_ce(spl, spt)
    total = (symbol_weight * symbol_loss + position_weight * position_loss
             + staff_position_weight * staff_loss)
    return symbol_loss, position_loss, staff_loss, total


if __name__ == "__main__":
    key = jax.random.PRNGKey(0)

    # ---------- Test 1: small, f32, no mask, single tile ----------
    k1, k2, k3, k4, k5, k6 = jax.random.split(key, 6)
    B, S = 2, 8
    C_SYM, C_STAFF, P = 32, 16, 2

    symbol_logits = jax.random.normal(k1, (B, S, C_SYM), jnp.float32)
    position_preds = jax.random.normal(k2, (B, S, P), jnp.float32)
    staff_position_logits = jax.random.normal(k3, (B, S, C_STAFF), jnp.float32)
    symbol_ids = jax.random.randint(k4, (B, S), 0, C_SYM, jnp.int32)
    symbol_ids = symbol_ids.at[0, 0].set(IGNORE_INDEX)
    symbol_ids = symbol_ids.at[1, 3].set(IGNORE_INDEX)
    positions = jax.random.normal(k5, (B, S, P), jnp.float32)
    staff_positions = jax.random.randint(k6, (B, S), -5, C_STAFF + 5, jnp.int32)

    predictions = {'symbol_logits': symbol_logits,
                   'position_preds': position_preds,
                   'staff_position_logits': staff_position_logits}
    targets = {'symbol_ids': symbol_ids,
               'positions': positions,
               'staff_positions': staff_positions}

    total_loss, loss_dict = music_notation_loss(predictions, targets)
    total_loss = jax.block_until_ready(total_loss)

    r_sym, r_pos, r_staff, r_total = _ref_loss(predictions, targets)
    assert abs(float(loss_dict['symbol_loss']) - float(r_sym)) < 1e-4
    assert abs(float(loss_dict['position_loss']) - float(r_pos)) < 1e-4
    assert abs(float(loss_dict['staff_position_loss']) - float(r_staff)) < 1e-4
    assert abs(float(loss_dict['total_loss']) - float(r_total)) < 1e-4

    # ---------- Test 2: multi-tile (remainder), bf16 inputs, mask, weights --
    k1, k2, k3, k4, k5, k6, k7 = jax.random.split(jax.random.PRNGKey(1), 7)
    B2, S2 = 2, 600  # N = 1200 -> 3 tiles of 512 with a 176-row remainder
    symbol_logits2 = jax.random.normal(k1, (B2, S2, C_SYM)).astype(jnp.bfloat16)
    position_preds2 = jax.random.normal(k2, (B2, S2, P)).astype(jnp.bfloat16)
    staff_logits2 = jax.random.normal(k3, (B2, S2, C_STAFF)).astype(jnp.bfloat16)
    symbol_ids2 = jax.random.randint(k4, (B2, S2), 0, C_SYM, jnp.int32)
    symbol_ids2 = symbol_ids2.at[0, 10].set(IGNORE_INDEX)
    symbol_ids2 = symbol_ids2.at[1, 599].set(IGNORE_INDEX)
    positions2 = jax.random.normal(k5, (B2, S2, P), jnp.float32)
    staff_positions2 = jax.random.randint(k6, (B2, S2), -5, C_STAFF + 5,
                                          jnp.int32)
    mask2 = (jax.random.uniform(k7, (B2, S2)) > 0.2).astype(jnp.float32)

    predictions2 = {'symbol_logits': symbol_logits2,
                    'position_preds': position_preds2,
                    'staff_position_logits': staff_logits2}
    targets2 = {'symbol_ids': symbol_ids2,
                'positions': positions2,
                'staff_positions': staff_positions2}

    w_sym, w_pos, w_staff = 2.0, 0.5, 1.5
    total2, dict2 = music_notation_loss(
        predictions2, targets2, mask=mask2,
        symbol_weight=w_sym, position_weight=w_pos,
        staff_position_weight=w_staff)
    total2 = jax.block_until_ready(total2)

    r_sym2, r_pos2, r_staff2, r_total2 = _ref_loss(
        predictions2, targets2, mask=mask2, symbol_weight=w_sym,
        position_weight=w_pos, staff_position_weight=w_staff)
    assert abs(float(dict2['symbol_loss']) - float(r_sym2)) < 1e-3
    assert abs(float(dict2['position_loss']) - float(r_pos2)) < 1e-3
    assert abs(float(dict2['staff_position_loss']) - float(r_staff2)) < 1e-3
    assert abs(float(dict2['total_loss']) - float(r_total2)) < 2e-3

    print("KERNEL_OK")
</pallas_src>

<mosaic_0001>
module attributes {stable_mosaic.version = 11 : i64} {
  func.func @kernel(%arg0: i32, %arg1: memref<16x32xf32, #tpu.memory_space<vmem>>, %arg2: memref<16x16xf32, #tpu.memory_space<vmem>>, %arg3: memref<16x2xf32, #tpu.memory_space<vmem>>, %arg4: memref<16x2xf32, #tpu.memory_space<vmem>>, %arg5: memref<16x2xi32, #tpu.memory_space<vmem>>, %arg6: memref<4xf32, #tpu.memory_space<smem>>, %arg7: memref<8xf32, #tpu.memory_space<smem>>) attributes {dimension_semantics = [#tpu.dimension_semantics<arbitrary>], iteration_bounds = array<i64: 1>, scalar_prefetch = 0 : i64, scratch_operands = 1 : i64, tpu.core_type = #tpu.core_type<tc>, window_params = [{transform_indices = @transform_0, window_bounds = array<i64: 16, 32>}, {transform_indices = @transform_1, window_bounds = array<i64: 16, 16>}, {transform_indices = @transform_2, window_bounds = array<i64: 16, 2>}, {transform_indices = @transform_3, window_bounds = array<i64: 16, 2>}, {transform_indices = @transform_4, window_bounds = array<i64: 16, 2>}, {transform_indices = @transform_5, window_bounds = array<i64: 4>}]} {
    %c0_i32 = arith.constant 0 : i32
    %0 = arith.cmpi eq, %arg0, %c0_i32 : i32
    %1 = arith.extui %0 : i1 to i32
    %c0_i32_0 = arith.constant 0 : i32
    %2 = arith.cmpi ne, %1, %c0_i32_0 : i32
    scf.if %2 {
      %cst_39 = arith.constant 0.000000e+00 : f32
      %c0_40 = arith.constant 0 : index
      %120 = memref.load %arg7[%c0_40] : memref<8xf32, #tpu.memory_space<smem>>
      memref.store %cst_39, %arg7[%c0_40] : memref<8xf32, #tpu.memory_space<smem>>
      %cst_41 = arith.constant 0.000000e+00 : f32
      %c1_42 = arith.constant 1 : index
      %121 = memref.load %arg7[%c1_42] : memref<8xf32, #tpu.memory_space<smem>>
      memref.store %cst_41, %arg7[%c1_42] : memref<8xf32, #tpu.memory_space<smem>>
      %cst_43 = arith.constant 0.000000e+00 : f32
      %c2_44 = arith.constant 2 : index
      %122 = memref.load %arg7[%c2_44] : memref<8xf32, #tpu.memory_space<smem>>
      memref.store %cst_43, %arg7[%c2_44] : memref<8xf32, #tpu.memory_space<smem>>
      %cst_45 = arith.constant 0.000000e+00 : f32
      %c3_46 = arith.constant 3 : index
      %123 = memref.load %arg7[%c3_46] : memref<8xf32, #tpu.memory_space<smem>>
      memref.store %cst_45, %arg7[%c3_46] : memref<8xf32, #tpu.memory_space<smem>>
      %cst_47 = arith.constant 0.000000e+00 : f32
      %c4_48 = arith.constant 4 : index
      %124 = memref.load %arg7[%c4_48] : memref<8xf32, #tpu.memory_space<smem>>
      memref.store %cst_47, %arg7[%c4_48] : memref<8xf32, #tpu.memory_space<smem>>
    } else {
    }
    %c0 = arith.constant 0 : index
    %c0_1 = arith.constant 0 : index
    %3 = vector.load %arg1[%c0, %c0_1] : memref<16x32xf32, #tpu.memory_space<vmem>>, vector<16x32xf32>
    %c0_2 = arith.constant 0 : index
    %c0_3 = arith.constant 0 : index
    %4 = vector.load %arg2[%c0_2, %c0_3] : memref<16x16xf32, #tpu.memory_space<vmem>>, vector<16x16xf32>
    %c0_4 = arith.constant 0 : index
    %c0_5 = arith.constant 0 : index
    %5 = vector.load %arg3[%c0_4, %c0_5] : memref<16x2xf32, #tpu.memory_space<vmem>>, vector<16x2xf32>
    %c0_6 = arith.constant 0 : index
    %c0_7 = arith.constant 0 : index
    %6 = vector.load %arg4[%c0_6, %c0_7] : memref<16x2xf32, #tpu.memory_space<vmem>>, vector<16x2xf32>
    %c0_8 = arith.constant 0 : index
    %c0_9 = arith.constant 0 : index
    %7 = vector.load %arg5[%c0_8, %c0_9] : memref<16x2xi32, #tpu.memory_space<vmem>>, vector<16x2xi32>
    %8 = vector.extract_strided_slice %7 {offsets = [0, 0], sizes = [16, 1], strides = [1, 1]} : vector<16x2xi32> to vector<16x1xi32>
    %9 = vector.extract_strided_slice %7 {offsets = [0, 1], sizes = [16, 1], strides = [1, 1]} : vector<16x2xi32> to vector<16x1xi32>
    %c16_i32 = arith.constant 16 : i32
    %10 = arith.muli %arg0, %c16_i32 : i32
    %11 = tpu.iota {dimensions = array<i32: 0>} : vector<16x1xi32>
    %12 = vector.broadcast %10 : i32 to vector<16x1xi32>
    %13 = arith.addi %12, %11 : vector<16x1xi32>
    %c16_i32_10 = arith.constant 16 : i32
    %14 = vector.broadcast %c16_i32_10 : i32 to vector<16x1xi32>
    %15 = arith.cmpi slt, %13, %14 : vector<16x1xi32>
    %cst = arith.constant dense<0xFF800000> : vector<16xf32>
    %16 = vector.multi_reduction <maximumf>, %3, %cst [1] : vector<16x32xf32> to vector<16xf32>
    %17 = vector.shape_cast %16 : vector<16xf32> to vector<16x1xf32>
    %18 = vector.broadcast %17 : vector<16x1xf32> to vector<16x32xf32>
    %19 = arith.subf %3, %18 : vector<16x32xf32>
    %20 = math.exp %19 : vector<16x32xf32>
    %cst_11 = arith.constant dense<0.000000e+00> : vector<16xf32>
    %21 = vector.multi_reduction <add>, %20, %cst_11 [1] : vector<16x32xf32> to vector<16xf32>
    %22 = vector.shape_cast %21 : vector<16xf32> to vector<16x1xf32>
    %23 = math.log %22 : vector<16x1xf32>
    %24 = arith.addf %17, %23 : vector<16x1xf32>
    %25 = tpu.iota {dimensions = array<i32: 1>} : vector<16x32xi32>
    %26 = vector.broadcast %8 : vector<16x1xi32> to vector<16x32xi32>
    %27 = arith.cmpi eq, %25, %26 : vector<16x32xi32>
    %cst_12 = arith.constant 0.000000e+00 : f32
    %28 = vector.broadcast %cst_12 : f32 to vector<16x32xf32>
    %29 = arith.select %27, %3, %28 : vector<16x32xi1>, vector<16x32xf32>
    %cst_13 = arith.constant dense<0.000000e+00> : vector<16xf32>
    %30 = vector.multi_reduction <add>, %29, %cst_13 [1] : vector<16x32xf32> to vector<16xf32>
    %31 = vector.shape_cast %30 : vector<16xf32> to vector<16x1xf32>
    %c-100_i32 = arith.constant -100 : i32
    %32 = vector.broadcast %c-100_i32 : i32 to vector<16x1xi32>
    %33 = arith.cmpi ne, %8, %32 : vector<16x1xi32>
    %34 = arith.andi %33, %15 : vector<16x1xi1>
    %35 = arith.subf %24, %31 : vector<16x1xf32>
    %cst_14 = arith.constant 0.000000e+00 : f32
    %36 = vector.broadcast %cst_14 : f32 to vector<16x1xf32>
    %37 = arith.select %34, %35, %36 : vector<16x1xi1>, vector<16x1xf32>
    %38 = vector.shape_cast %37 : vector<16x1xf32> to vector<1x16x1xf32>
    %cst_15 = arith.constant dense<0.000000e+00> : vector<1xf32>
    %39 = vector.multi_reduction <add>, %38, %cst_15 [1, 2] : vector<1x16x1xf32> to vector<1xf32>
    %40 = vector.shape_cast %39 : vector<1xf32> to vector<1x1x1xf32>
    %41 = vector.extract %40[0, 0, 0] : f32 from vector<1x1x1xf32>
    %42 = arith.extui %34 : vector<16x1xi1> to vector<16x1xi32>
    %43 = arith.sitofp %42 : vector<16x1xi32> to vector<16x1xf32>
    %44 = vector.shape_cast %43 : vector<16x1xf32> to vector<1x16x1xf32>
    %cst_16 = arith.constant dense<0.000000e+00> : vector<1xf32>
    %45 = vector.multi_reduction <add>, %44, %cst_16 [1, 2] : vector<1x16x1xf32> to vector<1xf32>
    %46 = vector.shape_cast %45 : vector<1xf32> to vector<1x1x1xf32>
    %47 = vector.extract %46[0, 0, 0] : f32 from vector<1x1x1xf32>
    %c0_i32_17 = arith.constant 0 : i32
    %c15_i32 = arith.constant 15 : i32
    %48 = vector.broadcast %c0_i32_17 : i32 to vector<16x1xi32>
    %49 = arith.maxsi %48, %9 : vector<16x1xi32>
    %50 = vector.broadcast %c15_i32 : i32 to vector<16x1xi32>
    %51 = arith.minsi %50, %49 : vector<16x1xi32>
    %cst_18 = arith.constant dense<0xFF800000> : vector<16xf32>
    %52 = vector.multi_reduction <maximumf>, %4, %cst_18 [1] : vector<16x16xf32> to vector<16xf32>
    %53 = vector.shape_cast %52 : vector<16xf32> to vector<16x1xf32>
    %54 = vector.broadcast %53 : vector<16x1xf32> to vector<16x16xf32>
    %55 = arith.subf %4, %54 : vector<16x16xf32>
    %56 = math.exp %55 : vector<16x16xf32>
    %cst_19 = arith.constant dense<0.000000e+00> : vector<16xf32>
    %57 = vector.multi_reduction <add>, %56, %cst_19 [1] : vector<16x16xf32> to vector<16xf32>
    %58 = vector.shape_cast %57 : vector<16xf32> to vector<16x1xf32>
    %59 = math.log %58 : vector<16x1xf32>
    %60 = arith.addf %53, %59 : vector<16x1xf32>
    %61 = tpu.iota {dimensions = array<i32: 1>} : vector<16x16xi32>
    %62 = vector.broadcast %51 : vector<16x1xi32> to vector<16x16xi32>
    %63 = arith.cmpi eq, %61, %62 : vector<16x16xi32>
    %cst_20 = arith.constant 0.000000e+00 : f32
    %64 = vector.broadcast %cst_20 : f32 to vector<16x16xf32>
    %65 = arith.select %63, %4, %64 : vector<16x16xi1>, vector<16x16xf32>
    %cst_21 = arith.constant dense<0.000000e+00> : vector<16xf32>
    %66 = vector.multi_reduction <add>, %65, %cst_21 [1] : vector<16x16xf32> to vector<16xf32>
    %67 = vector.shape_cast %66 : vector<16xf32> to vector<16x1xf32>
    %c-100_i32_22 = arith.constant -100 : i32
    %68 = vector.broadcast %c-100_i32_22 : i32 to vector<16x1xi32>
    %69 = arith.cmpi ne, %51, %68 : vector<16x1xi32>
    %70 = arith.andi %69, %15 : vector<16x1xi1>
    %71 = arith.subf %60, %67 : vector<16x1xf32>
    %cst_23 = arith.constant 0.000000e+00 : f32
    %72 = vector.broadcast %cst_23 : f32 to vector<16x1xf32>
    %73 = arith.select %70, %71, %72 : vector<16x1xi1>, vector<16x1xf32>
    %74 = vector.shape_cast %73 : vector<16x1xf32> to vector<1x16x1xf32>
    %cst_24 = arith.constant dense<0.000000e+00> : vector<1xf32>
    %75 = vector.multi_reduction <add>, %74, %cst_24 [1, 2] : vector<1x16x1xf32> to vector<1xf32>
    %76 = vector.shape_cast %75 : vector<1xf32> to vector<1x1x1xf32>
    %77 = vector.extract %76[0, 0, 0] : f32 from vector<1x1x1xf32>
    %78 = arith.extui %70 : vector<16x1xi1> to vector<16x1xi32>
    %79 = arith.sitofp %78 : vector<16x1xi32> to vector<16x1xf32>
    %80 = vector.shape_cast %79 : vector<16x1xf32> to vector<1x16x1xf32>
    %cst_25 = arith.constant dense<0.000000e+00> : vector<1xf32>
    %81 = vector.multi_reduction <add>, %80, %cst_25 [1, 2] : vector<1x16x1xf32> to vector<1xf32>
    %82 = vector.shape_cast %81 : vector<1xf32> to vector<1x1x1xf32>
    %83 = vector.extract %82[0, 0, 0] : f32 from vector<1x1x1xf32>
    %84 = arith.subf %5, %6 : vector<16x2xf32>
    %85 = math.absf %84 : vector<16x2xf32>
    %cst_26 = arith.constant 1.000000e+00 : f32
    %86 = vector.broadcast %cst_26 : f32 to vector<16x2xf32>
    %87 = arith.cmpf olt, %85, %86 : vector<16x2xf32>
    %cst_27 = arith.constant 5.000000e-01 : f32
    %88 = vector.broadcast %cst_27 : f32 to vector<16x2xf32>
    %89 = arith.mulf %88, %84 : vector<16x2xf32>
    %90 = arith.mulf %89, %84 : vector<16x2xf32>
    %cst_28 = arith.constant 5.000000e-01 : f32
    %91 = vector.broadcast %cst_28 : f32 to vector<16x2xf32>
    %92 = arith.subf %85, %91 : vector<16x2xf32>
    %93 = arith.select %87, %90, %92 : vector<16x2xi1>, vector<16x2xf32>
    %cst_29 = arith.constant 0.000000e+00 : f32
    %94 = vector.shape_cast %15 : vector<16x1xi1> to vector<16x1xi1>
    %95 = vector.broadcast %94 : vector<16x1xi1> to vector<16x2xi1>
    %96 = vector.broadcast %cst_29 : f32 to vector<16x2xf32>
    %97 = arith.select %95, %93, %96 : vector<16x2xi1>, vector<16x2xf32>
    %98 = vector.shape_cast %97 : vector<16x2xf32> to vector<1x16x2xf32>
    %cst_30 = arith.constant dense<0.000000e+00> : vector<1xf32>
    %99 = vector.multi_reduction <add>, %98, %cst_30 [1, 2] : vector<1x16x2xf32> to vector<1xf32>
    %100 = vector.shape_cast %99 : vector<1xf32> to vector<1x1x1xf32>
    %101 = vector.extract %100[0, 0, 0] : f32 from vector<1x1x1xf32>
    %c0_31 = arith.constant 0 : index
    %102 = memref.load %arg7[%c0_31] : memref<8xf32, #tpu.memory_space<smem>>
    %103 = arith.addf %102, %41 : f32
    %c0_32 = arith.constant 0 : index
    %104 = memref.load %arg7[%c0_32] : memref<8xf32, #tpu.memory_space<smem>>
    memref.store %103, %arg7[%c0_32] : memref<8xf32, #tpu.memory_space<smem>>
    %c1 = arith.constant 1 : index
    %105 = memref.load %arg7[%c1] : memref<8xf32, #tpu.memory_space<smem>>
    %106 = arith.addf %105, %47 : f32
    %c1_33 = arith.constant 1 : index
    %107 = memref.load %arg7[%c1_33] : memref<8xf32, #tpu.memory_space<smem>>
    memref.store %106, %arg7[%c1_33] : memref<8xf32, #tpu.memory_space<smem>>
    %c2 = arith.constant 2 : index
    %108 = memref.load %arg7[%c2] : memref<8xf32, #tpu.memory_space<smem>>
    %109 = arith.addf %108, %77 : f32
    %c2_34 = arith.constant 2 : index
    %110 = memref.load %arg7[%c2_34] : memref<8xf32, #tpu.memory_space<smem>>
    memref.store %109, %arg7[%c2_34] : memref<8xf32, #tpu.memory_space<smem>>
    %c3 = arith.constant 3 : index
    %111 = memref.load %arg7[%c3] : memref<8xf32, #tpu.memory_space<smem>>
    %112 = arith.addf %111, %83 : f32
    %c3_35 = arith.constant 3 : index
    %113 = memref.load %arg7[%c3_35] : memref<8xf32, #tpu.memory_space<smem>>
    memref.store %112, %arg7[%c3_35] : memref<8xf32, #tpu.memory_space<smem>>
    %c4 = arith.constant 4 : index
    %114 = memref.load %arg7[%c4] : memref<8xf32, #tpu.memory_space<smem>>
    %115 = arith.addf %114, %101 : f32
    %c4_36 = arith.constant 4 : index
    %116 = memref.load %arg7[%c4_36] : memref<8xf32, #tpu.memory_space<smem>>
    memref.store %115, %arg7[%c4_36] : memref<8xf32, #tpu.memory_space<smem>>
    %c0_i32_37 = arith.constant 0 : i32
    %117 = arith.cmpi eq, %arg0, %c0_i32_37 : i32
    %118 = arith.extui %117 : i1 to i32
    %c0_i32_38 = arith.constant 0 : i32
    %119 = arith.cmpi ne, %118, %c0_i32_38 : i32
    scf.if %119 {
      %c0_39 = arith.constant 0 : index
      %120 = memref.load %arg7[%c0_39] : memref<8xf32, #tpu.memory_space<smem>>
      %c1_40 = arith.constant 1 : index
      %121 = memref.load %arg7[%c1_40] : memref<8xf32, #tpu.memory_space<smem>>
      %122 = arith.divf %120, %121 : f32
      %c2_41 = arith.constant 2 : index
      %123 = memref.load %arg7[%c2_41] : memref<8xf32, #tpu.memory_space<smem>>
      %c3_42 = arith.constant 3 : index
      %124 = memref.load %arg7[%c3_42] : memref<8xf32, #tpu.memory_space<smem>>
      %125 = arith.divf %123, %124 : f32
      %c4_43 = arith.constant 4 : index
      %126 = memref.load %arg7[%c4_43] : memref<8xf32, #tpu.memory_space<smem>>
      %cst_44 = arith.constant 3.125000e-02 : f32
      %127 = arith.mulf %126, %cst_44 : f32
      %cst_45 = arith.constant 1.000000e+00 : f32
      %128 = arith.mulf %cst_45, %122 : f32
      %cst_46 = arith.constant 1.000000e+00 : f32
      %129 = arith.mulf %cst_46, %127 : f32
      %130 = arith.addf %128, %129 : f32
      %cst_47 = arith.constant 1.000000e+00 : f32
      %131 = arith.mulf %cst_47, %125 : f32
      %132 = arith.addf %130, %131 : f32
      %c0_48 = arith.constant 0 : index
      %133 = memref.load %arg6[%c0_48] : memref<4xf32, #tpu.memory_space<smem>>
      memref.store %122, %arg6[%c0_48] : memref<4xf32, #tpu.memory_space<smem>>
      %c1_49 = arith.constant 1 : index
      %134 = memref.load %arg6[%c1_49] : memref<4xf32, #tpu.memory_space<smem>>
      memref.store %127, %arg6[%c1_49] : memref<4xf32, #tpu.memory_space<smem>>
      %c2_50 = arith.constant 2 : index
      %135 = memref.load %arg6[%c2_50] : memref<4xf32, #tpu.memory_space<smem>>
      memref.store %125, %arg6[%c2_50] : memref<4xf32, #tpu.memory_space<smem>>
      %c3_51 = arith.constant 3 : index
      %136 = memref.load %arg6[%c3_51] : memref<4xf32, #tpu.memory_space<smem>>
      memref.store %132, %arg6[%c3_51] : memref<4xf32, #tpu.memory_space<smem>>
    } else {
    }
    return
  }
  func.func @transform_0(%arg0: i32) -> (i32, i32) {
    %c0_i32 = arith.constant 0 : i32
    %c0_i32_0 = arith.constant 0 : i32
    return %arg0, %c0_i32 : i32, i32
  }
  func.func @transform_1(%arg0: i32) -> (i32, i32) {
    %c0_i32 = arith.constant 0 : i32
    %c0_i32_0 = arith.constant 0 : i32
    return %arg0, %c0_i32 : i32, i32
  }
  func.func @transform_2(%arg0: i32) -> (i32, i32) {
    %c0_i32 = arith.constant 0 : i32
    %c0_i32_0 = arith.constant 0 : i32
    return %arg0, %c0_i32 : i32, i32
  }
  func.func @transform_3(%arg0: i32) -> (i32, i32) {
    %c0_i32 = arith.constant 0 : i32
    %c0_i32_0 = arith.constant 0 : i32
    return %arg0, %c0_i32 : i32, i32
  }
  func.func @transform_4(%arg0: i32) -> (i32, i32) {
    %c0_i32 = arith.constant 0 : i32
    %c0_i32_0 = arith.constant 0 : i32
    return %arg0, %c0_i32 : i32, i32
  }
  func.func @transform_5(%arg0: i32) -> i32 {
    %c0_i32 = arith.constant 0 : i32
    %c0_i32_0 = arith.constant 0 : i32
    return %c0_i32 : i32
  }
}

</mosaic_0001>

<bundles_post_ra>
// kernel: tpu_custom_call.1
= control target key start
LH: loop header
LB: loop body
LE: loop exit
PB: predicated region body
PF: predicated region fallthrough
CT: control target
= control target key end

     0   :  { %vm142_vm0 = vcmask 130048   ;;  %v402_v4 = vmov 1   ;;  %v403_v9 = vmov 0   ;;  %s545_s0 = inlined_call_operand.vmem [shape: f32[16,32], index: 0, kind: input, shape index: {}]   ;;  %s546_s1 = inlined_call_operand.vmem [shape: f32[16,16], index: 1, kind: input, shape index: {}]   ;;  %s547_s2 = inlined_call_operand.vmem [shape: f32[16,2], index: 2, kind: input, shape index: {}]   ;;  %s548_s3 = inlined_call_operand.vmem [shape: f32[16,2], index: 3, kind: input, shape index: {}]   ;;  %s549_s4 = inlined_call_operand.vmem [shape: s32[16,2], index: 4, kind: input, shape index: {}]   ;;  %s550_s5 = inlined_call_operand.hbm [shape: f32[4], index: 5, kind: output, shape index: {}]  }
   0x1   :  { %v37_v0 = vld [vmem:[%s546_s1] sm:$0xff]  ;;  %v448_v2 = vld [vmem:[%s546_s1 + $0x8] sm:$0xff]  ;;  %361 = vset.pattern.permute.xlu1 %v402_v4  ;;  %362 = vset.pattern.permute.xlu0 %v403_v9 }
   0x2   :  { %v443_v1 = vld [vmem:[%s549_s4] sm:$0xff]  ;;  %v143_v3 = vsel %vm142_vm0, %v37_v0, -inf  ;;  %v455_v5 = vld [vmem:[%s549_s4 + $0x8] sm:$0xff]  ;;  %v146_v7 = vsel %vm142_vm0, %v448_v2, -inf }
   0x3   :  { %vm134_vm1 = vcmp.gt.s32.totalorder %v443_v1, 0  ;;  %144 = vmax.xlane.f32.xlu0 %v143_v3  ;;  %vm136_vm2 = vcmp.gt.s32.totalorder %v455_v5, 0 }
   0x4   :  { %v135_v6 = vsel %vm134_vm1, %v443_v1, 0  ;;  %v137_v8 = vsel %vm136_vm2, %v455_v5, 0 }
   0x5   :  { %vm138_vm3 = vcmp.lt.s32.totalorder %v135_v6, 15 }
   0x6   :  { %10 = vsyncpa [#allocation4], 0  ;;  %v462_v10 = vsel %vm138_vm3, %v135_v6, 15  ;;  %vm140_vm4 = vcmp.lt.s32.totalorder %v137_v8, 15  ;;  %v467_v11 = vld [vmem:[%s545_s0] sm:$0xff]  ;;  %vm54_vm5 = vcmask 261120   ;;  %v79_v16 = vlaneseq }
   0x7   :  { %168 = vperm.xlu1 %361, %v462_v10   ;;  %147 = vmax.xlane.f32.xlu0 %v146_v7  ;;  %v470_v12 = vsel %vm140_vm4, %v137_v8, 15  ;;  %v55_v13 = vsel %vm54_vm5, %v467_v11, -inf  ;;  %v36_v14 = vld [vmem:[%s545_s0 + $0x8] sm:$0xff]  ;;  %vm183_vm10 = vcmp.ne.s32.totalorder %v462_v10, 4294967196  ;;  %s404_s0 = smov 127   ;;  %v405_v62 = vmov 0.0  }
   0x8   :  { %v58_v15 = vsel %vm54_vm5, %v36_v14, -inf  ;;  %v80_v17 = vand.u32 127, %v79_v16  ;;  %vm184_vm11 = vcmp.ne.s32.totalorder %v470_v12, 4294967196  ;;  %v330_v63 = vsel %vm183_vm10, 1.0, %v405_v62  ;;  %v39_v6 = vld [vmem:[%s547_s2] sm:$0xff]  ;;  %v40_v7 = vld [vmem:[%s547_s2 + $0x8] sm:$0xff] }
   0x9   :  { %v41_v8 = vld [vmem:[%s548_s3] sm:$0xff]  ;;  %vm97_vm12 = vcmp.ne.s32.totalorder %v443_v1, 4294967196  ;;  %vm98_vm13 = vcmp.ne.s32.totalorder %v455_v5, 4294967196  ;;  %vm255_vm1 = vcmask 15360   ;;  %s390_s23 = scalar_lea.hbm %s550_s5, 16 }
   0xa   :  { %v235_v10 = vsub.f32 %v39_v6, %v41_v8  ;;  %v328_v16 = vsel %vm97_vm12, 1.0, %v405_v62  ;;  %p391_p0 = scmp.ne.s32.totalorder %s550_s5, %s390_s23  ;;  %p394_p1 = scmp.lt.u32.totalorder %s390_s23, %s550_s5 }
   0xb   :  { %171 = vperm.xlu1 %361, %v470_v12   ;;  %56 = vmax.xlane.f32.xlu0 %v55_v13 }
   0xc   :  { %v237_v12 = vand.u32 2147483647, %v235_v10  ;;  %p396_p2 = pnand %p394_p1, %p391_p0 }
   0xe   :  { %vm239_vm14 = vcmp.lt.f32.partialorder %v237_v12, 1.0 }
   0xf   :  { %363 = vset.pattern.permute.xlu1 %v403_v9  ;;  %v42_v9 = vld [vmem:[%s548_s3 + $0x8] sm:$0xff] }
  0x2f   :  { %59 = vmax.xlane.f32.xlu1 %v58_v15 }
  0x40   :  { %85 = vperm.xlu1 %363, %v455_v5  }
  0x86   :  { %v169_v18 = vpop.permute.xlu1 %168 }
  0x87   :  { %vm173_vm6 = vcmp.eq.s32.totalorder %v80_v17, %v169_v18 }
  0x88   :  { %v175_v19 = vsel %vm173_vm6, %v37_v0, 0.0 }
  0x89   :  { %v177_v20 = vsel %vm142_vm0, %v175_v19, 0.0 }
  0x8a   :  { %178 = vadd.xlane.f32.xlu1 %v177_v20  ;;  %v172_v31 = vpop.permute.xlu1 %171  ;;  %v332_v20 = vadd.f32 -0.5, %v237_v12 }
  0x8b   :  { %vm174_vm8 = vcmp.eq.s32.totalorder %v80_v17, %v172_v31 }
  0x8c   :  { %v176_v43 = vsel %vm174_vm8, %v448_v2, 0.0 }
  0x8d   :  { %v180_v45 = vsel %vm142_vm0, %v176_v43, 0.0 }
  0x90   :  { %v145_v21 = vpop.xlane.xlu0 %144 }
  0x91   :  { %v149_v22 = vsub.f32 %v37_v0, %v145_v21 }
  0x93   :  { %v151_v23 = vmul.f32 1.442695, %v149_v22 }
  0x94   :  { %v148_v24 = vpop.xlane.xlu0 %147 }
  0x95   :  { %370 = vpow2.f32 %v151_v23  ;;  %v150_v25 = vsub.f32 %v448_v2, %v148_v24  ;;  %v331_v2 = vsel %vm184_vm11, 1.0, %v405_v62 }
  0x97   :  { %v153_v26 = vmul.f32 1.442695, %v150_v25 }
  0x98   :  { %v489_v38 = vpop.xlane.xlu0 %56 }
  0x99   :  { %372 = vpow2.f32 %v153_v26  ;;  %v61_v39 = vsub.f32 %v467_v11, %v489_v38 }
  0x9b   :  { %v63_v41 = vmul.f32 1.442695, %v61_v39 }
  0x9f   :  { %v371_v27 = vpop.eup %370 }
  0xa0   :  { %v155_v28 = vsel %vm142_vm0, %v371_v27, 0.0 }
  0xa1   :  { %156 = vadd.xlane.f32.xlu0 %v155_v28 }
  0xa3   :  { %v373_v29 = vpop.eup %372 }
  0xa4   :  { %v158_v30 = vsel %vm142_vm0, %v373_v29, 0.0  ;;  %vm105_vm0 = vcmask 7168  }
  0xa5   :  { %159 = vadd.xlane.f32.xlu0 %v158_v30  ;;  %v122_v22 = vsel %vm105_vm0, %v328_v16, 0.0 }
  0xbb   :  { %82 = vperm.xlu0 %362, %v443_v1  }
  0xbc   :  { %v484_v32 = vpop.xlane.xlu1 %59 }
  0xbd   :  { %v62_v33 = vsub.f32 %v36_v14, %v484_v32 }
  0xbf   :  { %v65_v34 = vmul.f32 1.442695, %v62_v33  ;;  %369 = vset.pattern.permute.xlu0 %v402_v4  ;;  %v364_v4 = vpack.i.bf16 %v331_v2, %v330_v63 }
  0xc0   :  { %v86_v35 = vpop.permute.xlu1 %85 }
  0xc1   :  { %374 = vpow2.f32 %v65_v34  ;;  %vm88_vm7 = vcmp.eq.s32.totalorder %v80_v17, %v86_v35 }
  0xc2   :  { %v90_v36 = vsel %vm88_vm7, %v36_v14, 0.0  ;;  %376 = vpow2.f32 %v63_v41  ;;  %v241_v14 = vmul.f32 0.5, %v235_v10 }
  0xc3   :  { %v94_v37 = vsel %vm54_vm5, %v90_v36, 0.0 }
  0xc4   :  { %95 = vadd.xlane.f32.xlu1 %v94_v37  ;;  %v243_v18 = vmul.f32 %v241_v14, %v235_v10 }
  0xcb   :  { %v375_v40 = vpop.eup %374 }
  0xcc   :  { %v70_v42 = vsel %vm54_vm5, %v375_v40, 0.0  ;;  %v377_v44 = vpop.eup %376 }
  0xcd   :  { %71 = vadd.xlane.f32.xlu1 %v70_v42  ;;  %v67_v46 = vsel %vm54_vm5, %v377_v44, 0.0 }
  0xda   :  { %181 = vadd.xlane.f32.xlu0 %v180_v45 }
  0xde   :  { %68 = vadd.xlane.f32.xlu0 %v67_v46 }
 0x117   :  { %v179_v55 = vpop.xlane.xlu1 %178 }
 0x12e   :  { %v157_v47 = vpop.xlane.xlu0 %156 }
 0x12f   :  { %378 = vlog2.f32 %v157_v47 }
 0x132   :  { %v160_v48 = vpop.xlane.xlu0 %159 }
 0x133   :  { %380 = vlog2.f32 %v160_v48 }
 0x139   :  { %v379_v52 = vpop.eup %378 }
 0x13a   :  { %v83_v49 = vpop.permute.xlu0 %82  ;;  %v162_v53 = vmul.f32 0.6931472, %v379_v52 }
 0x13b   :  { %vm87_vm9 = vcmp.eq.s32.totalorder %v80_v17, %v83_v49  ;;  %v329_v17 = vsel %vm98_vm13, 1.0, %v405_v62 }
 0x13c   :  { %v89_v50 = vsel %vm87_vm9, %v467_v11, 0.0  ;;  %v165_v54 = vadd.f32 %v162_v53, %v145_v21  ;;  %v236_v11 = vsub.f32 %v40_v7, %v42_v9  ;;  %v123_v23 = vsel %vm105_vm0, %v329_v17, 0.0 }
 0x13d   :  { %v91_v51 = vsel %vm54_vm5, %v89_v50, 0.0  ;;  %v381_v58 = vpop.eup %380  ;;  %v124_v26 = vadd.f32 %v123_v23, %v122_v22 }
 0x13e   :  { %92 = vadd.xlane.f32.xlu0 %v91_v51  ;;  %v187_v56 = vsub.f32 %v165_v54, %v179_v55  ;;  %v164_v59 = vmul.f32 0.6931472, %v381_v58  ;;  %v238_v13 = vand.u32 2147483647, %v236_v11  ;;  %v242_v15 = vmul.f32 0.5, %v236_v11 }
 0x140   :  { %v189_v57 = vsel %vm183_vm10, %v187_v56, 0.0  ;;  %v166_v60 = vadd.f32 %v164_v59, %v148_v24  ;;  %v244_v19 = vmul.f32 %v242_v15, %v236_v11  ;;  %v333_v21 = vadd.f32 -0.5, %v238_v13 }
 0x141   :  { %vm240_vm15 = vcmp.lt.f32.partialorder %v238_v13, 1.0  ;;  %v247_v24 = vsel %vm239_vm14, %v243_v18, %v332_v20 }
 0x142   :  { %v248_v25 = vsel %vm240_vm15, %v244_v19, %v333_v21  ;;  %v256_v27 = vsel %vm255_vm1, %v247_v24, 0.0 }
 0x143   :  { %v257_v28 = vsel %vm255_vm1, %v248_v25, 0.0 }
 0x144   :  { %v258_v29 = vadd.f32 %v257_v28, %v256_v27 }
 0x151   :  { %v96_v30 = vpop.xlane.xlu1 %95 }
 0x154   :  { %193 = vrot.lane.b32.xlu0 %v189_v57, %s404_s0 }
 0x15a   :  { %v72_v31 = vpop.xlane.xlu1 %71 }
 0x15b   :  { %382 = vlog2.f32 %v72_v31 }
 0x165   :  { %v383_v34 = vpop.eup %382 }
 0x166   :  { %v76_v35 = vmul.f32 0.6931472, %v383_v34 }
 0x167   :  { %v182_v61 = vpop.xlane.xlu0 %181 }
 0x168   :  { %v188_v0 = vsub.f32 %v166_v60, %v182_v61  ;;  %v78_v37 = vadd.f32 %v76_v35, %v484_v32 }
 0x16a   :  { %v190_v3 = vsel %vm184_vm11, %v188_v0, 0.0  ;;  %v102_v40 = vsub.f32 %v78_v37, %v96_v30 }
 0x16b   :  { %195 = vrot.lane.b32.xlu1 %v190_v3, %s404_s0  ;;  %v69_v33 = vpop.xlane.xlu0 %68 }
 0x16c   :  { %384 = vlog2.f32 %v69_v33  ;;  %v104_v44 = vsel %vm98_vm13, %v102_v40, 0.0 }
 0x16d   :  { %v107_v47 = vsel %vm105_vm0, %v104_v44, 0.0 }
 0x16f   :  { %365 = vrot.lane.b32.xlu1 %v364_v4, %s404_s0 }
 0x176   :  { %v385_v36 = vpop.eup %384 }
 0x177   :  { %v74_v39 = vmul.f32 0.6931472, %v385_v36 }
 0x179   :  { %v77_v41 = vadd.f32 %v74_v39, %v489_v38 }
 0x193   :  { %125 = vadd.xlane.f32.xlu1 %v124_v26 }
 0x197   :  { %259 = vadd.xlane.f32.xlu1 %v258_v29 }
 0x1cb   :  { %v93_v42 = vpop.xlane.xlu0 %92 }
 0x1cc   :  { %v101_v43 = vsub.f32 %v77_v41, %v93_v42 }
 0x1ce   :  { %v103_v45 = vsel %vm97_vm12, %v101_v43, 0.0 }
 0x1cf   :  { %v106_v46 = vsel %vm105_vm0, %v103_v45, 0.0  ;;  %v194_v49 = vpop.permute.xlu0 %193 }
 0x1d0   :  { %v108_v48 = vadd.f32 %v107_v47, %v106_v46  ;;  %v199_v50 = vsel %vm105_vm0, %v194_v49, 0.0 }
 0x1d2   :  { %109 = vadd.xlane.f32.xlu0 %v108_v48 }
 0x1dd   :  { %v196_v32 = vpop.permute.xlu1 %195 }
 0x1de   :  { %v200_v38 = vsel %vm105_vm0, %v196_v32, 0.0 }
 0x1df   :  { %v201_v51 = vadd.f32 %v200_v38, %v199_v50 }
 0x1e1   :  { %v366_v52 = vpop.permute.xlu1 %365  ;;  %202 = vadd.xlane.f32.xlu0 %v201_v51 }
 0x1e2   :  { %v368_v5 = vunpack.i.h.bf16 %v366_v52  ;;  %v367_v53 = vunpack.i.l.bf16 %v366_v52 }
 0x1e4   :  { %v223_v1 = vsel %vm105_vm0, %v367_v53, 0.0  ;;  %v224_v54 = vsel %vm105_vm0, %v368_v5, 0.0 }
 0x1e5   :  { %v225_v55 = vadd.f32 %v224_v54, %v223_v1 }
 0x1e7   :  { %226 = vadd.xlane.f32.xlu0 %v225_v55 }
 0x220   :  { %v126_v56 = vpop.xlane.xlu1 %125 }
 0x221   :  { %v127_v57 = vrot.slane %v126_v56, 4 }
 0x223   :  { %v128_v58 = vadd.f32 %v127_v57, %v126_v56 }
 0x224   :  { %v260_v4 = vpop.xlane.xlu1 %259 }
 0x225   :  { %v129_v59 = vrot.slane %v128_v58, 2  ;;  %v261_v9 = vrot.slane %v260_v4, 4 }
 0x227   :  { %v130_v62 = vadd.f32 %v129_v59, %v128_v58  ;;  %v262_v11 = vadd.f32 %v261_v9, %v260_v4 }
 0x229   :  { %v131_v2 = vrot.slane %v130_v62, 1  ;;  %v263_v14 = vrot.slane %v262_v11, 2 }
 0x22b   :  { %v132_v7 = vadd.f32 %v131_v2, %v130_v62  ;;  %v264_v19 = vadd.f32 %v263_v14, %v262_v11 }
 0x22d   :  { %v265_v24 = vrot.slane %v264_v19, 1 }
 0x22f   :  { %v266_v27 = vadd.f32 %v265_v24, %v264_v19 }
 0x25f   :  { %v110_v60 = vpop.xlane.xlu0 %109 }
 0x260   :  { %v111_v61 = vrot.slane %v110_v60, 4 }
 0x262   :  { %v112_v63 = vadd.f32 %v111_v61, %v110_v60 }
 0x264   :  { %v113_v0 = vrot.slane %v112_v63, 2 }
 0x266   :  { %v114_v3 = vadd.f32 %v113_v0, %v112_v63 }
 0x268   :  { %v115_v6 = vrot.slane %v114_v3, 1 }
 0x26a   :  { %v116_v8 = vadd.f32 %v115_v6, %v114_v3 }
 0x26c   :  { %342 = vpush %v116_v8 }
 0x26d   :  { %344 = vpush %v132_v7 }
 0x26e   :  { %v203_v10 = vpop.xlane.xlu0 %202 }
 0x26f   :  { %v204_v12 = vrot.slane %v203_v10, 4 }
 0x271   :  { %v205_v13 = vadd.f32 %v204_v12, %v203_v10 }
 0x273   :  { %v206_v15 = vrot.slane %v205_v13, 2 }
 0x274   :  { %v227_v16 = vpop.xlane.xlu0 %226 }
 0x275   :  { %v228_v17 = vrot.slane %v227_v16, 4  ;;  %v207_v18 = vadd.f32 %v206_v15, %v205_v13 }
 0x277   :  { %v229_v20 = vadd.f32 %v228_v17, %v227_v16  ;;  %v208_v21 = vrot.slane %v207_v18, 1 }
 0x279   :  { %v230_v22 = vrot.slane %v229_v20, 2  ;;  %v209_v23 = vadd.f32 %v208_v21, %v207_v18 }
 0x27b   :  { %v231_v25 = vadd.f32 %v230_v22, %v229_v20  ;;  %346 = vpush %v209_v23 }
 0x27d   :  { %v232_v26 = vrot.slane %v231_v25, 1 }
 0x27f   :  { %v233_v28 = vadd.f32 %v232_v26, %v231_v25 }
 0x281   :  { %348 = vpush %v233_v28 }
 0x282   :  { %350 = vpush %v266_v27 }
 0x29d   :  { %s343_s2 = spop %342 }
 0x29e   :  { %s345_s3 = spop %344 }
 0x29f   :  { %v293_v29 = vstv %s345_s3 }
 0x2a0   :  { %386 = vrcp.f32 %v293_v29 }
 0x2aa   :  { %v387_v30 = vpop.eup %386 }
 0x2ab   :  { %352 = vpush %v387_v30 }
 0x2ac   :  { %s347_s11 = spop %346 }
 0x2b2   :  { %s349_s12 = spop %348 }
 0x2b3   :  { %v299_v31 = vstv %s349_s12  ;;  %s351_s13 = spop %350 }
 0x2b4   :  { %388 = vrcp.f32 %v299_v31  ;;  %s304_s14 = smul.f32 0.03125, %s351_s13 }
 0x2b6   :  { %310 = sst [smem:[#allocation3 + $0x1]] %s304_s14 }
 0x2be   :  { %v389_v33 = vpop.eup %388 }
 0x2bf   :  { %354 = vpush %v389_v33 }
 0x2dc   :  { %s353_s15 = spop %352 }
 0x2dd   :  { %s296_s16 = smul.f32 %s353_s15, %s343_s2 }
 0x2df   :  { %308 = sst [smem:[#allocation3]] %s296_s16 }
 0x2e0   :  { %s305_s18 = sadd.f32 %s304_s14, %s296_s16 }
 0x2f0   :  { %s355_s17 = spop %354 }
 0x2f1   :  { %s302_s19 = smul.f32 %s355_s17, %s347_s11 }
 0x2f3   :  { %s306_s20 = sadd.f32 %s305_s18, %s302_s19 }
 0x2f4   :  { %312 = sst [smem:[#allocation3 + $0x2]] %s302_s19 }
 0x2f5   :  { %314 = sst [smem:[#allocation3 + $0x3]] %s306_s20 }
 0x2f6   :  { %399 = shalt.err (!%p396_p2)
}
 0x2f7   :  { %s406_s26 = smov [#allocation3]  }
 0x2f8   :  { %322 = dma.smem_to_hbm %s406_s26, 16, %s550_s5, [#allocation4]  }
 0x2f9   :  { %400 = dma.done.wait [#allocation4], 16  }
 0x2fa   :  { %401 = vsyncadd [#allocation4], 4294967280 }
 0x2fb   :  { %326 = sfence }
 0x2fc   :  { %327 = vsyncpa [#allocation4], 1 }

</bundles_post_ra>
